<compile_context>
chip_gen: v7x
topology: tpu7x:2x2x1
jax: 0.10.0
libtpu: 0.0.40
codegen_flags: <defaults>
</compile_context>

<pallas_src>
import jax
import jax.numpy as jnp
from jax.experimental import pallas as pl
from jax.experimental.pallas import tpu as pltpu


def dqn_mlp_kernel(x_ref, w1_ref, b1_ref, w2_ref, b2_ref, w3_ref, b3_ref, o_ref):
    # x_ref: (TB, 4) bf16; weights bf16; biases f32; o_ref (TB, 2) f32.
    x = x_ref[...]

    # Layer 1: Linear(4, 256) + ReLU   (bf16 inputs, f32 accumulation)
    h1 = jnp.dot(x, w1_ref[...], preferred_element_type=jnp.float32) + b1_ref[...]
    h1 = jnp.maximum(h1, 0.0)                                   # (TB, 256) f32

    # Layer 2: Linear(256, 16) + ReLU
    h2 = jnp.dot(h1.astype(w2_ref.dtype), w2_ref[...],
                 preferred_element_type=jnp.float32) + b2_ref[...]
    h2 = jnp.maximum(h2, 0.0)                                   # (TB, 16) f32

    # Layer 3: Linear(16, 2)
    out = jnp.dot(h2.astype(w3_ref.dtype), w3_ref[...],
                  preferred_element_type=jnp.float32) + b3_ref[...]
    o_ref[...] = out.astype(o_ref.dtype)                        # (TB, 2) f32


def _round_up(n, m):
    return ((n + m - 1) // m) * m


def dqn_forward(x, params, *, block_b=512):
    """x: (B, 4) float32. params: W in (in, out) layout, biases (1, N).

    Returns (B, 2) float32 Q-values.
    """
    B = x.shape[0]

    # bf16 weights/activations (MXU-native, half the DMA bytes); f32 biases.
    bf = jnp.bfloat16
    w1 = params["w1"].astype(bf)
    w2 = params["w2"].astype(bf)
    w3 = params["w3"].astype(bf)
    b1 = params["b1"].astype(jnp.float32)
    b2 = params["b2"].astype(jnp.float32)
    b3 = params["b3"].astype(jnp.float32)
    x_bf = x.astype(bf)

    # Batch tile: multiple of 8 (sublane rule).  For small B just round B up;
    # for large B use block_b (>=512 amortizes the ~0.35us per-grid-step cost).
    TB = block_b if B >= block_b else _round_up(max(B, 1), 8)
    Bp = _round_up(B, TB)
    if Bp != B:
        x_bf = jnp.pad(x_bf, ((0, Bp - B), (0, 0)))

    grid = (Bp // TB,)
    const = lambda i: (0, 0)   # weights/biases: same block every grid step

    out_padded = pl.pallas_call(
        dqn_mlp_kernel,
        out_shape=jax.ShapeDtypeStruct((Bp, 2), jnp.float32),
        grid=grid,
        in_specs=[
            pl.BlockSpec((TB, 4), lambda i: (i, 0)),   # x: tiled over batch
            pl.BlockSpec((4, 256), const),             # w1 (resident)
            pl.BlockSpec((1, 256), const),             # b1
            pl.BlockSpec((256, 16), const),            # w2
            pl.BlockSpec((1, 16), const),              # b2
            pl.BlockSpec((16, 2), const),              # w3
            pl.BlockSpec((1, 2), const),               # b3
        ],
        out_specs=pl.BlockSpec((TB, 2), lambda i: (i, 0)),
        compiler_params=pltpu.CompilerParams(
            dimension_semantics=("parallel",),         # shard batch across TCs (v7x)
        ),
    )(x_bf, w1, b1, w2, b2, w3, b3)

    return out_padded[:B]


def init_params(key):
    """Deterministic synthetic init matching the nn.Linear shapes of the module."""
    k1, k2, k3, k4, k5, k6 = jax.random.split(key, 6)
    w1 = jax.random.normal(k1, (4, 256), jnp.float32) * 0.1
    b1 = jax.random.normal(k2, (1, 256), jnp.float32) * 0.01
    w2 = jax.random.normal(k3, (256, 16), jnp.float32) * 0.1
    b2 = jax.random.normal(k4, (1, 16), jnp.float32) * 0.01
    w3 = jax.random.normal(k5, (16, 2), jnp.float32) * 0.1
    b3 = jax.random.normal(k6, (1, 2), jnp.float32) * 0.01
    return dict(w1=w1, b1=b1, w2=w2, b2=b2, w3=w3, b3=b3)


def reference_forward_f32(x, p):
    h1 = jnp.maximum(x @ p["w1"] + p["b1"], 0.0)
    h2 = jnp.maximum(h1 @ p["w2"] + p["b2"], 0.0)
    return h2 @ p["w3"] + p["b3"]


def reference_forward_bf16(x, p):
    """Same mixed-precision recipe as the kernel (bf16 operands, f32 accum)."""
    bf = jnp.bfloat16
    h1 = jnp.maximum(
        jnp.dot(x.astype(bf), p["w1"].astype(bf),
                preferred_element_type=jnp.float32) + p["b1"], 0.0)
    h2 = jnp.maximum(
        jnp.dot(h1.astype(bf), p["w2"].astype(bf),
                preferred_element_type=jnp.float32) + p["b2"], 0.0)
    return jnp.dot(h2.astype(bf), p["w3"].astype(bf),
                   preferred_element_type=jnp.float32) + p["b3"]


if __name__ == "__main__":
    key = jax.random.PRNGKey(0)
    kx, kx2, kp = jax.random.split(key, 3)
    params = init_params(kp)

    # --- small batch (per-env-step shape): single grid step, batch padded to 8 ---
    B = 8
    x = jax.random.normal(kx, (B, 4), jnp.float32)
    out = jax.block_until_ready(dqn_forward(x, params))
    assert out.shape == (B, 2), out.shape
    ref_bf = reference_forward_bf16(x, params)
    ref_f32 = reference_forward_f32(x, params)
    assert jnp.allclose(out, ref_bf, atol=1e-3, rtol=1e-3), "mismatch vs bf16 reference"
    assert jnp.allclose(out, ref_f32, atol=3e-2, rtol=3e-2), "mismatch vs f32 reference"

    # --- replay-buffer-style batch: multi-step grid + ragged last tile padding ---
    B2 = 300
    x2 = jax.random.normal(kx2, (B2, 4), jnp.float32)
    out2 = jax.block_until_ready(dqn_forward(x2, params, block_b=128))  # grid=(3,)
    assert out2.shape == (B2, 2), out2.shape
    ref2_bf = reference_forward_bf16(x2, params)
    ref2_f32 = reference_forward_f32(x2, params)
    assert jnp.allclose(out2, ref2_bf, atol=1e-3, rtol=1e-3), "mismatch vs bf16 reference (tiled)"
    assert jnp.allclose(out2, ref2_f32, atol=3e-2, rtol=3e-2), "mismatch vs f32 reference (tiled)"

    print("KERNEL_OK")
</pallas_src>

<mosaic_0001>
module attributes {stable_mosaic.version = 11 : i64} {
  func.func @dqn_mlp_kernel(%arg0: i32, %arg1: memref<8x4xbf16, #tpu.memory_space<vmem>>, %arg2: memref<4x256xbf16, #tpu.memory_space<vmem>>, %arg3: memref<1x256xf32, #tpu.memory_space<vmem>>, %arg4: memref<256x16xbf16, #tpu.memory_space<vmem>>, %arg5: memref<1x16xf32, #tpu.memory_space<vmem>>, %arg6: memref<16x2xbf16, #tpu.memory_space<vmem>>, %arg7: memref<1x2xf32, #tpu.memory_space<vmem>>, %arg8: memref<8x2xf32, #tpu.memory_space<vmem>>) attributes {dimension_semantics = [#tpu.dimension_semantics<parallel>], iteration_bounds = array<i64: 1>, scalar_prefetch = 0 : i64, scratch_operands = 0 : i64, tpu.core_type = #tpu.core_type<tc>, window_params = [{transform_indices = @transform_0, window_bounds = array<i64: 8, 4>}, {pipeline_mode = #tpu.pipeline_mode<synchronous>, transform_indices = @transform_1, window_bounds = array<i64: 4, 256>}, {pipeline_mode = #tpu.pipeline_mode<synchronous>, transform_indices = @transform_2, window_bounds = array<i64: 1, 256>}, {pipeline_mode = #tpu.pipeline_mode<synchronous>, transform_indices = @transform_3, window_bounds = array<i64: 256, 16>}, {pipeline_mode = #tpu.pipeline_mode<synchronous>, transform_indices = @transform_4, window_bounds = array<i64: 1, 16>}, {pipeline_mode = #tpu.pipeline_mode<synchronous>, transform_indices = @transform_5, window_bounds = array<i64: 16, 2>}, {pipeline_mode = #tpu.pipeline_mode<synchronous>, transform_indices = @transform_6, window_bounds = array<i64: 1, 2>}, {transform_indices = @transform_7, window_bounds = array<i64: 8, 2>}]} {
    %c0 = arith.constant 0 : index
    %c0_0 = arith.constant 0 : index
    %0 = vector.load %arg1[%c0, %c0_0] : memref<8x4xbf16, #tpu.memory_space<vmem>>, vector<8x4xbf16>
    %c0_1 = arith.constant 0 : index
    %c0_2 = arith.constant 0 : index
    %1 = vector.load %arg2[%c0_1, %c0_2] : memref<4x256xbf16, #tpu.memory_space<vmem>>, vector<4x256xbf16>
    %cst = arith.constant dense<0.000000e+00> : vector<8x256xf32>
    %2 = tpu.matmul %0, %1, %cst {dimension_numbers = #tpu.dot_dimension_numbers<[1], [0], [0], [1], [0, 0, 1, 1], [], []>} : vector<8x4xbf16>, vector<4x256xbf16>, vector<8x256xf32> -> vector<8x256xf32>
    %c0_3 = arith.constant 0 : index
    %c0_4 = arith.constant 0 : index
    %3 = vector.load %arg3[%c0_3, %c0_4] : memref<1x256xf32, #tpu.memory_space<vmem>>, vector<1x256xf32>
    %4 = vector.broadcast %3 : vector<1x256xf32> to vector<8x256xf32>
    %5 = arith.addf %2, %4 : vector<8x256xf32>
    %cst_5 = arith.constant 0.000000e+00 : f32
    %6 = vector.broadcast %cst_5 : f32 to vector<8x256xf32>
    %7 = arith.maximumf %5, %6 : vector<8x256xf32>
    %8 = arith.truncf %7 : vector<8x256xf32> to vector<8x256xbf16>
    %c0_6 = arith.constant 0 : index
    %c0_7 = arith.constant 0 : index
    %9 = vector.load %arg4[%c0_6, %c0_7] : memref<256x16xbf16, #tpu.memory_space<vmem>>, vector<256x16xbf16>
    %cst_8 = arith.constant dense<0.000000e+00> : vector<8x16xf32>
    %10 = tpu.matmul %8, %9, %cst_8 {dimension_numbers = #tpu.dot_dimension_numbers<[1], [0], [0], [1], [0, 0, 1, 1], [], []>} : vector<8x256xbf16>, vector<256x16xbf16>, vector<8x16xf32> -> vector<8x16xf32>
    %c0_9 = arith.constant 0 : index
    %c0_10 = arith.constant 0 : index
    %11 = vector.load %arg5[%c0_9, %c0_10] : memref<1x16xf32, #tpu.memory_space<vmem>>, vector<1x16xf32>
    %12 = vector.broadcast %11 : vector<1x16xf32> to vector<8x16xf32>
    %13 = arith.addf %10, %12 : vector<8x16xf32>
    %cst_11 = arith.constant 0.000000e+00 : f32
    %14 = vector.broadcast %cst_11 : f32 to vector<8x16xf32>
    %15 = arith.maximumf %13, %14 : vector<8x16xf32>
    %16 = arith.truncf %15 : vector<8x16xf32> to vector<8x16xbf16>
    %c0_12 = arith.constant 0 : index
    %c0_13 = arith.constant 0 : index
    %17 = vector.load %arg6[%c0_12, %c0_13] : memref<16x2xbf16, #tpu.memory_space<vmem>>, vector<16x2xbf16>
    %cst_14 = arith.constant dense<0.000000e+00> : vector<8x2xf32>
    %18 = tpu.matmul %16, %17, %cst_14 {dimension_numbers = #tpu.dot_dimension_numbers<[1], [0], [0], [1], [0, 0, 1, 1], [], []>} : vector<8x16xbf16>, vector<16x2xbf16>, vector<8x2xf32> -> vector<8x2xf32>
    %c0_15 = arith.constant 0 : index
    %c0_16 = arith.constant 0 : index
    %19 = vector.load %arg7[%c0_15, %c0_16] : memref<1x2xf32, #tpu.memory_space<vmem>>, vector<1x2xf32>
    %20 = vector.broadcast %19 : vector<1x2xf32> to vector<8x2xf32>
    %21 = arith.addf %18, %20 : vector<8x2xf32>
    %c0_17 = arith.constant 0 : index
    %c0_18 = arith.constant 0 : index
    %22 = vector.load %arg8[%c0_17, %c0_18] : memref<8x2xf32, #tpu.memory_space<vmem>>, vector<8x2xf32>
    tpu.vector_store %arg8[%c0_17, %c0_18], %21 {strides = array<i32>} : memref<8x2xf32, #tpu.memory_space<vmem>>, vector<8x2xf32>,
    return
  }
  func.func @transform_0(%arg0: i32) -> (i32, i32) {
    %c0_i32 = arith.constant 0 : i32
    %c0_i32_0 = arith.constant 0 : i32
    return %arg0, %c0_i32 : i32, i32
  }
  func.func @transform_1(%arg0: i32) -> (i32, i32) {
    %c0_i32 = arith.constant 0 : i32
    %c0_i32_0 = arith.constant 0 : i32
    %c0_i32_1 = arith.constant 0 : i32
    return %c0_i32, %c0_i32_0 : i32, i32
  }
  func.func @transform_2(%arg0: i32) -> (i32, i32) {
    %c0_i32 = arith.constant 0 : i32
    %c0_i32_0 = arith.constant 0 : i32
    %c0_i32_1 = arith.constant 0 : i32
    return %c0_i32, %c0_i32_0 : i32, i32
  }
  func.func @transform_3(%arg0: i32) -> (i32, i32) {
    %c0_i32 = arith.constant 0 : i32
    %c0_i32_0 = arith.constant 0 : i32
    %c0_i32_1 = arith.constant 0 : i32
    return %c0_i32, %c0_i32_0 : i32, i32
  }
  func.func @transform_4(%arg0: i32) -> (i32, i32) {
    %c0_i32 = arith.constant 0 : i32
    %c0_i32_0 = arith.constant 0 : i32
    %c0_i32_1 = arith.constant 0 : i32
    return %c0_i32, %c0_i32_0 : i32, i32
  }
  func.func @transform_5(%arg0: i32) -> (i32, i32) {
    %c0_i32 = arith.constant 0 : i32
    %c0_i32_0 = arith.constant 0 : i32
    %c0_i32_1 = arith.constant 0 : i32
    return %c0_i32, %c0_i32_0 : i32, i32
  }
  func.func @transform_6(%arg0: i32) -> (i32, i32) {
    %c0_i32 = arith.constant 0 : i32
    %c0_i32_0 = arith.constant 0 : i32
    %c0_i32_1 = arith.constant 0 : i32
    return %c0_i32, %c0_i32_0 : i32, i32
  }
  func.func @transform_7(%arg0: i32) -> (i32, i32) {
    %c0_i32 = arith.constant 0 : i32
    %c0_i32_0 = arith.constant 0 : i32
    return %arg0, %c0_i32 : i32, i32
  }
}

</mosaic_0001>

<bundles_post_ra>
// kernel: tpu_custom_call.1
= control target key start
LH: loop header
LB: loop body
LE: loop exit
PB: predicated region body
PF: predicated region fallthrough
CT: control target
= control target key end

     0   :  { %vm54_vm0 = vcmask 1041408   ;;  %v421_v1 = vmov 0   ;;  %vm50_vm1 = vcmask 31744   ;;  %v31_v21 = vlaneseq  ;;  %s533_s1 = inlined_call_operand.vmem [shape: bf16[4,256], index: 1, kind: input, shape index: {}]   ;;  %s534_s0 = inlined_call_operand.vmem [shape: bf16[8,4], index: 0, kind: input, shape index: {}]   ;;  %s535_s3 = inlined_call_operand.vmem [shape: bf16[256,16], index: 3, kind: input, shape index: {}]   ;;  %s536_s2 = inlined_call_operand.vmem [shape: f32[1,256], index: 2, kind: input, shape index: {}]   ;;  %s537_s5 = inlined_call_operand.vmem [shape: bf16[16,2], index: 5, kind: input, shape index: {}]   ;;  %s538_s4 = inlined_call_operand.vmem [shape: f32[1,16], index: 4, kind: input, shape index: {}]   ;;  %s539_s6 = inlined_call_operand.vmem [shape: f32[1,2], index: 6, kind: input, shape index: {}]   ;;  %s540_s7 = inlined_call_operand.vmem [shape: f32[8,2], index: 7, kind: output, shape index: {}]  }
   0x1   :  { %v348_v0 = vld.sshfl [vmem:[%s533_s1] sm:$0x33 pattern:$0x76325410]  ;;  %93 = vmatprep.mubr.bf16.mxu0 %v421_v1  ;;  %v406_v7 = vld [vmem:[%s535_s3 + $0x48] sm:$0xff]   ;;  %v408_v9 = vld [vmem:[%s535_s3 + $0x50] sm:$0xff]  }
   0x2   :  { %v49_v2 = vcombine.high %v348_v0, %v348_v0  ;;  %v56_v3 = vsel %vm54_vm0, %v348_v0, 0  ;;  %v404_v4 = vld [vmem:[%s535_s3 + $0x40] sm:$0xff]   ;;  %v407_v8 = vld [vmem:[%s535_s3 + $0x8] sm:$0xff]   ;;  %v409_v10 = vld [vmem:[%s535_s3 + $0x10] sm:$0xff]   ;;  %v32_v22 = vshrl.u32 %v31_v21, 7  ;;  %v422_v39 = vmov 0.0  }
   0x3   :  { %v27_v5 = vld [vmem:[%s534_s0] sm:$0xf]  ;;  %371 = vmatprep.subr.bf16.mxu1 %v404_v4  ;;  %v410_v11 = vld [vmem:[%s535_s3 + $0x58] sm:$0xff]   ;;  %v414_v15 = vld [vmem:[%s535_s3 + $0x68] sm:$0xff]   ;;  %vm423_vm2 = vmmov 0   ;;  %vm298_vm3 = vcmask 130048  }
   0x4   :  { %v405_v6 = vld [vmem:[%s535_s3] sm:$0xff]   ;;  %349 = vmatprep.subr.msk.bf16.mxu0 %vm54_vm0, %v49_v2  ;;  %v411_v12 = vld [vmem:[%s535_s3 + $0x18] sm:$0xff]   ;;  %v415_v16 = vld [vmem:[%s535_s3 + $0x28] sm:$0xff]   ;;  %v33_v23 = vsub.s32 0, %v32_v22  ;;  %v37_v25 = vsub.s32 1, %v32_v22  ;;  %vm342_vm4 = vcmask 15360  }
   0x5   :  { %62 = vmatpush1.bf16.msra.mxu0 %v56_v3  ;;  %372 = vmatpush3.bf16.msra.mxu1 %v405_v6  ;;  %v412_v13 = vld [vmem:[%s535_s3 + $0x60] sm:$0xff]   ;;  %v416_v17 = vld [vmem:[%s535_s3 + $0x70] sm:$0xff]   ;;  %v418_v19 = vld [vmem:[%s535_s3 + $0x78] sm:$0xff]  }
   0x6   :  { %373 = vmatprep.subr.bf16.mxu1 %v406_v7  ;;  %v413_v14 = vld [vmem:[%s535_s3 + $0x20] sm:$0xff]   ;;  %v417_v18 = vld [vmem:[%s535_s3 + $0x30] sm:$0xff]   ;;  %v419_v20 = vld [vmem:[%s535_s3 + $0x38] sm:$0xff]   ;;  %395 = vmatprep.subr.bf16.mxu0 %v422_v39 }
   0x7   :  { %v29_v24 = vld [vmem:[%s536_s2] sm:$0x3] }
   0x8   :  { %350 = vmatmul.mubr.msk.bf16.vlgmr.msra.gmra.mrb[0].mxu0 %vm50_vm1, %v27_v5  ;;  %v34_v26 = vrot.slane %v29_v24, %v33_v23  ;;  %v38_v27 = vrot.slane %v29_v24, %v37_v25  ;;  %v420_v38 = vld [vmem:[%s537_s5] sm:$0xff]  }
   0x9   :  { %374 = vmatpush3.bf16.msra.mxu1 %v407_v8  ;;  %396 = vmatpush3.bf16.msra.mxu0 %v420_v38  ;;  %v351_v41 = vld [vmem:[%s538_s4] ss:$0 sm:$0xff] }
   0xa   :  { %375 = vmatprep.subr.bf16.mxu1 %v408_v9  ;;  %397 = vmatprep.mubr.msk.bf16.mxu0 %vm423_vm2, %v422_v39  ;;  %v368_v49 = vld [vmem:[%s539_s6] ss:$0 sm:$0xff] }
   0xd   :  { %376 = vmatpush3.bf16.msra.mxu1 %v409_v10 }
   0xe   :  { %377 = vmatprep.subr.bf16.mxu1 %v410_v11 }
  0x11   :  { %378 = vmatpush3.bf16.msra.mxu1 %v411_v12 }
  0x12   :  { %379 = vmatprep.subr.bf16.mxu1 %v412_v13 }
  0x15   :  { %380 = vmatpush3.bf16.msra.mxu1 %v413_v14 }
  0x16   :  { %381 = vmatprep.subr.bf16.mxu1 %v414_v15 }
  0x19   :  { %382 = vmatpush3.bf16.msra.mxu1 %v415_v16 }
  0x1a   :  { %383 = vmatprep.subr.bf16.mxu1 %v416_v17 }
  0x1d   :  { %384 = vmatpush3.bf16.msra.mxu1 %v417_v18 }
  0x1e   :  { %385 = vmatprep.subr.bf16.mxu1 %v418_v19 }
  0x21   :  { %386 = vmatpush3.bf16.msra.mxu1 %v419_v20 }
  0xdb   :  { %v95_v28 = vpop.f32.mrb[0].mxu0 }
  0xdc   :  { %v96_v29 = vadd.f32 %v95_v28, %v34_v26  ;;  %v97_v30 = vpop.f32.mrb[1].mxu0 }
  0xdd   :  { %v98_v31 = vadd.f32 %v97_v30, %v38_v27  ;;  %v99_v32 = vpop.f32.mrb[2].mxu0 }
  0xde   :  { %v102_v33 = vmax.f32 %v96_v29, 0.0  ;;  %v100_v34 = vpop.f32.mrb[3].mxu0 }
  0xdf   :  { %v103_v35 = vmax.f32 %v98_v31, 0.0 }
  0xe0   :  { %v104_v37 = vpack.c.bf16 %v102_v33, %v102_v33 }
  0xe1   :  { %v105_v36 = vpack.c.bf16 %v103_v35, %v103_v35 }
  0xe3   :  { %273 = vmatprep.mubr.bf16.mxu1 %v105_v36 }
  0xe4   :  { %274 = vmatmul.mubr.bf16.vlgmr.msra.gmra.mrb[0].mxu1 %v104_v37 }
 0x1b7   :  { %v387_v40 = vpop.f32.mrb[0].mxu1 }
 0x1b8   :  { %v388_v42 = vpop.f32.mrb[1].mxu1 }
 0x1b9   :  { %v389_v43 = vadd.f32 %v388_v42, %v387_v40  ;;  %v390_v44 = vpop.f32.mrb[2].mxu1 }
 0x1ba   :  { %v391_v45 = vpop.f32.mrb[3].mxu1 }
 0x1bb   :  { %v276_v46 = vadd.f32 %v389_v43, %v351_v41 }
 0x1bd   :  { %v281_v47 = vmax.f32 %v276_v46, 0.0 }
 0x1bf   :  { %v282_v48 = vpack.c.bf16 %v281_v47, %v281_v47 }
 0x1c1   :  { %398 = vmatmul.mubr.msk.bf16.vlgmr.msra.gmra.mrb[4].mxu0 %vm298_vm3, %v282_v48 }
 0x294   :  { %v336_v50 = vpop.f32.mrb[4].mxu0 }
 0x295   :  { %v337_v51 = vadd.f32 %v368_v49, %v336_v50  ;;  %v399_v52 = vpop.f32.mrb[5].mxu0 }
 0x296   :  { %v339_v53 = vpop.f32.mrb[6].mxu0 }
 0x297   :  { %343 = vst.msk [vmem:[%s540_s7] sm:$0xff] %vm342_vm4, %v337_v51  ;;  %v400_v54 = vpop.f32.mrb[7].mxu0 }

</bundles_post_ra>
